<compile_context>
chip_gen: v7x
topology: tpu7x:2x2x1
jax: 0.10.0
libtpu: 0.0.40
codegen_flags: <defaults>
</compile_context>

<pallas_src>
import jax
import jax.numpy as jnp
from jax.experimental import pallas as pl
from jax.experimental.pallas import tpu as pltpu


def _round_up(x, m):
    return -(-x // m) * m


def _make_mean_kernel_2d(t, d):
    """Kernel for the flattened (TB, T*D) layout. Sums T static lane-aligned
    slices into an f32 accumulator, then scales by 1/T (wrapper-level T)."""
    inv_t = 1.0 / t

    def kernel(x_ref, o_ref):
        # x_ref: (TB, T*D) VMEM tile; o_ref: (TB, D) VMEM tile.
        acc = x_ref[:, 0:d].astype(jnp.float32)
        for k in range(1, t):                      # static unrolled loop
            acc = acc + x_ref[:, k * d:(k + 1) * d].astype(jnp.float32)
        o_ref[...] = (acc * inv_t).astype(o_ref.dtype)

    return kernel


def _make_mean_kernel_3d(t):
    """Fallback kernel for D % 128 != 0: reduce the (padded) sublane track axis.
    Divisor comes from the wrapper-level T, not the tile shape."""
    inv_t = 1.0 / t

    def kernel(x_ref, o_ref):
        # x_ref: (TB, T, D) VMEM tile; o_ref: (TB, D) VMEM tile.
        s = jnp.sum(x_ref[...], axis=1, dtype=jnp.float32)
        o_ref[...] = (s * inv_t).astype(o_ref.dtype)

    return kernel


def _pick_batch_tile(b, bytes_in_per_row, bytes_out_per_row, sub,
                     vmem_budget_bytes=8 * 1024 * 1024, max_tile=1024):
    """Pick a batch-tile size: multi-MiB tiles to approach the HBM roofline,
    small enough that the double-buffered input + output fits the budget on
    every generation, sublane-aligned, and split so the grid has >= 2 (ideally
    an even number of) steps for v7x megacore."""
    per_row = 2 * bytes_in_per_row + 2 * bytes_out_per_row   # double-buffered
    tb = min(b, max_tile, max(sub, vmem_budget_bytes // per_row))
    if tb < b:
        tb = max(sub, (tb // sub) * sub)

    # Megacore: both v7x TensorCores only stream HBM if each gets grid steps.
    # Shrinking tb only reduces the VMEM footprint, so this is always safe.
    if b >= 2 * sub:
        steps = -(-b // tb)
        if steps == 1:
            tb = max(sub, _round_up(-(-b // 2), sub))
        elif steps % 2 == 1 and steps < 8:
            cand = max(sub, _round_up(-(-b // (steps + 1)), sub))
            if -(-b // cand) % 2 == 0:
                tb = cand
    return min(tb, b)


def _mean_aggregator_pallas(inputs):
    b, t, d = inputs.shape
    itemsize = jnp.dtype(inputs.dtype).itemsize
    # Sublane group for this dtype: 8 rows (f32), 16 (bf16), 32 (int8).
    sub = 8 * max(1, 4 // itemsize)

    use_2d = (d % 128 == 0)
    if use_2d:
        bytes_in_per_row = t * d * itemsize                    # dense, exact
    else:
        # 3-D fallback: track axis sits on sublanes and pads to `sub`.
        bytes_in_per_row = _round_up(t, sub) * d * itemsize
    bytes_out_per_row = d * itemsize

    tb = _pick_batch_tile(b, bytes_in_per_row, bytes_out_per_row, sub)
    grid = (pl.cdiv(b, tb),)

    # Explicit, generation-safe scoped-VMEM limit: actual double-buffered
    # footprint with generous headroom, capped well under v7x's 32 MiB scope.
    footprint = 2 * tb * bytes_in_per_row + 2 * tb * bytes_out_per_row
    vmem_limit = int(min(28 << 20, max(16 << 20, 2 * footprint)))

    cost = pl.CostEstimate(
        flops=b * t * d + b * d,
        transcendentals=0,
        bytes_accessed=(b * t * d + b * d) * itemsize,
    )
    compiler_params = pltpu.CompilerParams(
        dimension_semantics=("parallel",),      # independent batch tiles
        vmem_limit_bytes=vmem_limit,
    )

    if use_2d:
        x2 = inputs.reshape(b, t * d)           # free: contiguous view
        return pl.pallas_call(
            _make_mean_kernel_2d(t, d),
            out_shape=jax.ShapeDtypeStruct((b, d), inputs.dtype),
            grid_spec=pltpu.PrefetchScalarGridSpec(
                num_scalar_prefetch=0,
                grid=grid,
                in_specs=[pl.BlockSpec((tb, t * d), lambda i: (i, 0))],
                out_specs=pl.BlockSpec((tb, d), lambda i: (i, 0)),
            ),
            compiler_params=compiler_params,
            cost_estimate=cost,
        )(x2)

    # Fallback: keep (t, d) full-extent so the (8,128) rule holds for any D.
    return pl.pallas_call(
        _make_mean_kernel_3d(t),
        out_shape=jax.ShapeDtypeStruct((b, d), inputs.dtype),
        grid_spec=pltpu.PrefetchScalarGridSpec(
            num_scalar_prefetch=0,
            grid=grid,
            in_specs=[pl.BlockSpec((tb, t, d), lambda i: (i, 0, 0))],
            out_specs=pl.BlockSpec((tb, d), lambda i: (i, 0)),
        ),
        compiler_params=compiler_params,
        cost_estimate=cost,
    )(inputs)


def mean_aggregator(inputs, *, force_pallas=False,
                    min_bytes_for_pallas=4 * 1024 * 1024):
    """Pallas equivalent of MeanAggregator.forward: mean over axis 1.

    inputs: (batch, track, latent) -> (batch, latent)

    Below a few MiB the pallas_call launch + pipeline prologue costs more than
    XLA's fused reduce (and a standalone kernel blocks producer fusion), so
    fall back to plain jnp.mean there.
    # TODO(synk): for production, fuse this mean into the producer of the
    # (B, T, D) latents so the tracks never round-trip HBM.
    """
    b, t, d = inputs.shape
    nbytes = b * t * d * jnp.dtype(inputs.dtype).itemsize
    if not force_pallas and nbytes < min_bytes_for_pallas:
        return jnp.mean(inputs, axis=1)
    return _mean_aggregator_pallas(inputs)


if __name__ == "__main__":
    key = jax.random.PRNGKey(0)

    # 1) The module's shipped shape (batch=2, img_count=5 tracks, latent=128).
    #    Force the Pallas path so the 2-D kernel itself is exercised here.
    b0, t0, d0 = 2, 5, 128
    x0 = jax.random.normal(key, (b0, t0, d0), dtype=jnp.float32)
    out0 = jax.block_until_ready(mean_aggregator(x0, force_pallas=True))
    ref0 = jnp.mean(x0, axis=1)
    assert out0.shape == (b0, d0)
    assert jnp.allclose(out0, ref0, atol=1e-6, rtol=1e-6)

    # Auto-dispatch path (falls back to jnp.mean for this tiny size).
    out0_auto = jax.block_until_ready(mean_aggregator(x0))
    assert jnp.allclose(out0_auto, ref0, atol=1e-6, rtol=1e-6)

    # 2) A larger batch exercising the tiled, pipelined, megacore-friendly grid
    #    (4096 rows -> 4 grid steps of 1024 with the default budget).
    b1, t1, d1 = 4096, 5, 128
    k1, k2 = jax.random.split(key)
    x1 = jax.random.normal(k1, (b1, t1, d1), dtype=jnp.float32)
    out1 = jax.block_until_ready(mean_aggregator(x1))
    ref1 = jnp.mean(x1, axis=1)
    assert out1.shape == (b1, d1)
    assert jnp.allclose(out1, ref1, atol=1e-5, rtol=1e-5)

    # 3) bf16 inputs: kept bf16 through the dense DMA (half the HBM bytes);
    #    the f32 widen happens only inside the in-register accumulation.
    x2 = jax.random.normal(k2, (b1, t1, d1), dtype=jnp.bfloat16)
    out2 = jax.block_until_ready(mean_aggregator(x2))
    ref2 = jnp.mean(x2.astype(jnp.float32), axis=1).astype(jnp.bfloat16)
    assert out2.dtype == jnp.bfloat16
    assert jnp.allclose(out2.astype(jnp.float32), ref2.astype(jnp.float32),
                        atol=2e-2, rtol=2e-2)

    # 4) Non-128-multiple latent dim exercises the 3-D fallback path.
    b3, t3, d3 = 16, 5, 96
    x3 = jax.random.normal(k1, (b3, t3, d3), dtype=jnp.float32)
    out3 = jax.block_until_ready(mean_aggregator(x3, force_pallas=True))
    ref3 = jnp.mean(x3, axis=1)
    assert out3.shape == (b3, d3)
    assert jnp.allclose(out3, ref3, atol=1e-6, rtol=1e-6)

    print("KERNEL_OK")
</pallas_src>

<mosaic_0001>
module attributes {stable_mosaic.version = 11 : i64} {
  func.func @kernel(%arg0: i32, %arg1: memref<2x640xf32, #tpu.memory_space<vmem>>, %arg2: memref<2x128xf32, #tpu.memory_space<vmem>>) attributes {dimension_semantics = [#tpu.dimension_semantics<parallel>], iteration_bounds = array<i64: 1>, scalar_prefetch = 0 : i64, scratch_operands = 0 : i64, tpu.core_type = #tpu.core_type<tc>, window_params = [{transform_indices = @transform_0, window_bounds = array<i64: 2, 640>}, {transform_indices = @transform_1, window_bounds = array<i64: 2, 128>}]} {
    %c0 = arith.constant 0 : index
    %c0_0 = arith.constant 0 : index
    %0 = vector.load %arg1[%c0, %c0_0] : memref<2x640xf32, #tpu.memory_space<vmem>>, vector<2x128xf32>
    %c0_1 = arith.constant 0 : index
    %c128 = arith.constant 128 : index
    %1 = vector.load %arg1[%c0_1, %c128] : memref<2x640xf32, #tpu.memory_space<vmem>>, vector<2x128xf32>
    %2 = arith.addf %0, %1 : vector<2x128xf32>
    %c0_2 = arith.constant 0 : index
    %c256 = arith.constant 256 : index
    %3 = vector.load %arg1[%c0_2, %c256] : memref<2x640xf32, #tpu.memory_space<vmem>>, vector<2x128xf32>
    %4 = arith.addf %2, %3 : vector<2x128xf32>
    %c0_3 = arith.constant 0 : index
    %c384 = arith.constant 384 : index
    %5 = vector.load %arg1[%c0_3, %c384] : memref<2x640xf32, #tpu.memory_space<vmem>>, vector<2x128xf32>
    %6 = arith.addf %4, %5 : vector<2x128xf32>
    %c0_4 = arith.constant 0 : index
    %c512 = arith.constant 512 : index
    %7 = vector.load %arg1[%c0_4, %c512] : memref<2x640xf32, #tpu.memory_space<vmem>>, vector<2x128xf32>
    %8 = arith.addf %6, %7 : vector<2x128xf32>
    %cst = arith.constant 2.000000e-01 : f32
    %9 = vector.broadcast %cst : f32 to vector<2x128xf32>
    %10 = arith.mulf %8, %9 : vector<2x128xf32>
    %c0_5 = arith.constant 0 : index
    %c0_6 = arith.constant 0 : index
    %11 = vector.load %arg2[%c0_5, %c0_6] : memref<2x128xf32, #tpu.memory_space<vmem>>, vector<2x128xf32>
    tpu.vector_store %arg2[%c0_5, %c0_6], %10 {strides = array<i32>} : memref<2x128xf32, #tpu.memory_space<vmem>>, vector<2x128xf32>,
    return
  }
  func.func @transform_0(%arg0: i32) -> (i32, i32) {
    %c0_i32 = arith.constant 0 : i32
    %c0_i32_0 = arith.constant 0 : i32
    return %arg0, %c0_i32 : i32, i32
  }
  func.func @transform_1(%arg0: i32) -> (i32, i32) {
    %c0_i32 = arith.constant 0 : i32
    %c0_i32_0 = arith.constant 0 : i32
    return %arg0, %c0_i32 : i32, i32
  }
}

</mosaic_0001>

<bundles_post_ra>
// kernel: tpu_custom_call.1
= control target key start
LH: loop header
LB: loop body
LE: loop exit
PB: predicated region body
PF: predicated region fallthrough
CT: control target
= control target key end

     0   :  { %6 = vsyncpa [#allocation3], 0  ;;  %s133_s0 = inlined_call_operand.hbm [shape: f32[2,640], index: 0, kind: input, shape index: {}]   ;;  %s134_s1 = inlined_call_operand.hbm [shape: f32[2,128], index: 1, kind: output, shape index: {}]  }
   0x1   :  { %7 = vsyncpa [#allocation4], 0  ;;  %s97_s6 = smov [#allocation2]   ;;  %s49_s10 = scalar_lea.hbm %s133_s0, 160 }
   0x2   :  { %s14_s7 = sshll.u32 %s97_s6, 4  ;;  %p50_p0 = scmp.ne.s32.totalorder %s133_s0, %s49_s10  ;;  %s15_s7 = int_to_ptr.vmem [resolvable:$true] %s14_s7 }
   0x3   :  { %p53_p1 = scmp.lt.u32.totalorder %s49_s10, %s133_s0 }
   0x5   :  { %p55_p2 = pnand %p53_p1, %p50_p0 }
   0x7   :  { %58 = shalt.err (!%p55_p2)
}
   0x8   :  { %s59_s15 = scalar_lea.vmem %s15_s7, 160  ;;  %p64_p4 = scmp.lt.s32.totalorder %s15_s7, %s15_s7 }
   0x9   :  { %p60_p3 = scmp.ne.s32.totalorder %s15_s7, %s59_s15  ;;  %p65_p5 = scmp.lt.s32.totalorder %s59_s15, %s59_s15 }
   0xb   :  { %p66_p6 = por %p65_p5, %p64_p4 }
   0xd   :  { %p67_p7 = pnand %p66_p6, %p60_p3 }
   0xf   :  { %70 = shalt.err (!%p67_p7)
}
  0x10   :  { %17 = dma.hbm_to_vmem [thread:$0]  %s133_s0, 160, %s15_s7, [#allocation3]  }
  0x11   :  { %93 = dma.done.wait [#allocation3], 160  }
  0x12   :  { %94 = vsyncadd [#allocation3], 4294967136  ;;  %v21_v0 = vld [vmem:[#allocation2] sm:$0x3]  ;;  %v22_v1 = vld [vmem:[#allocation2 + $0x2] sm:$0x3] }
  0x13   :  { %v24_v2 = vld [vmem:[#allocation2 + $0x4] sm:$0x3]  ;;  %v23_v3 = vadd.f32 %v22_v1, %v21_v0  ;;  %v26_v4 = vld [vmem:[#allocation2 + $0x6] sm:$0x3]  ;;  %v28_v6 = vld [vmem:[#allocation2 + $0x8] sm:$0x3] }
  0x14   :  { %s98_s18 = smov [#allocation5]  }
  0x15   :  { %v25_v5 = vadd.f32 %v24_v2, %v23_v3  ;;  %s38_s19 = sshll.u32 %s98_s18, 4  ;;  %s39_s19 = int_to_ptr.vmem [resolvable:$true] %s38_s19 }
  0x16   :  { %s71_s20 = scalar_lea.vmem %s39_s19, 32  ;;  %p76_p9 = scmp.lt.s32.totalorder %s39_s19, %s39_s19 }
  0x17   :  { %v27_v7 = vadd.f32 %v26_v4, %v25_v5  ;;  %p72_p8 = scmp.ne.s32.totalorder %s39_s19, %s71_s20  ;;  %p77_p10 = scmp.lt.s32.totalorder %s71_s20, %s71_s20 }
  0x19   :  { %v29_v8 = vadd.f32 %v28_v6, %v27_v7  ;;  %p78_p11 = por %p77_p10, %p76_p9 }
  0x1b   :  { %v30_v9 = vmul.f32 0.2, %v29_v8  ;;  %p79_p12 = pnand %p78_p11, %p72_p8 }
  0x1d   :  { %31 = vst [vmem:[#allocation5] sm:$0x3] %v30_v9 }
  0x1e   :  { %82 = shalt.err (!%p79_p12)
}
  0x1f   :  { %s83_s22 = scalar_lea.hbm %s134_s1, 32 }
  0x20   :  { %p84_p13 = scmp.ne.s32.totalorder %s134_s1, %s83_s22  ;;  %p87_p0 = scmp.lt.u32.totalorder %s83_s22, %s134_s1 }
  0x22   :  { %p89_p1 = pnand %p87_p0, %p84_p13 }
  0x24   :  { %92 = shalt.err (!%p89_p1)
}
  0x25   :  { %41 = dma.vmem_to_hbm [thread:$0]  %s39_s19, 32, %s134_s1, [#allocation4]  }
  0x26   :  { %95 = dma.done.wait [#allocation4], 32  }
  0x27   :  { %96 = vsyncadd [#allocation4], 4294967264 }
  0x28   :  { %45 = vsyncpa [#allocation3], 1 }
  0x29   :  { %46 = vsyncpa [#allocation4], 1 }

</bundles_post_ra>
